<compile_context>
chip_gen: v6e
topology: v6e:2x2x1
jax: 0.10.0
libtpu: 0.0.40
codegen_flags: <defaults>
</compile_context>

<pallas_src>
import jax
import jax.numpy as jnp
from jax.experimental import pallas as pl
from jax.experimental.pallas import tpu as pltpu

EMBED = 32                     # embed_size
HEADS = 4                      # heads
HEAD_DIM = EMBED // HEADS      # 8
FWD_EXP = 4                    # forward_expansion
HIDDEN = FWD_EXP * EMBED       # 128
SEQ = 8
BATCH = 2
EPS = 1e-5                     # nn.LayerNorm default eps
SCALE = 1.0 / (HEAD_DIM ** 0.5)

ROWS = BATCH * SEQ             # flattened token rows = 16
HROWS = HEADS * ROWS           # head-stacked rows     = 64
NEG = -1e30                    # additive mask value (finite; exp underflows to 0)


def _layer_norm(x, gamma, beta):
    mu = jnp.mean(x, axis=-1, keepdims=True)
    var = jnp.mean((x - mu) ** 2, axis=-1, keepdims=True)
    return (x - mu) * jax.lax.rsqrt(var + EPS) * gamma + beta


def _kernel(x_ref, qres_ref, wqkv_ref, bqkv_ref, mask_ref, wo_ref,
            w1_ref, b1_ref, w2_ref, vecs_ref, out_ref):
    vecs = vecs_ref[...]                                           # (6, E) f32

    # ---- fused q/k/v in-projection: one MXU push --------------------------------
    # x    : (16, 96) bf16   = [xq | xk | xv] along lanes
    # wqkv : (96, 96) bf16   block-diag [Wq.T; Wk.T; Wv.T]
    qkv = jnp.dot(x_ref[...], wqkv_ref[...],
                  preferred_element_type=jnp.float32) + bqkv_ref[...]   # (16, 96) f32
    qkvb = qkv.astype(jnp.bfloat16)                                # single cast

    # ---- head-stacked layout: lanes (H*D) -> rows (H*B*L, D) --------------------
    # row r = h*16 + n*8 + l, so rows with the same (h, n) form contiguous 8-blocks.
    def to_heads(base):                                            # -> (64, 8) bf16
        return jnp.concatenate(
            [qkvb[:, base + h * HEAD_DIM: base + (h + 1) * HEAD_DIM]
             for h in range(HEADS)], axis=0)

    q_r = to_heads(0)
    k_r = to_heads(EMBED)
    v_r = to_heads(2 * EMBED)

    # ---- attention for all (head, batch) blocks in two MXU pushes ----------------
    s = jnp.einsum('ld,md->lm', q_r, k_r,
                   preferred_element_type=jnp.float32)             # (64, 64) f32
    s = s * SCALE + mask_ref[...]                                  # mask off-block
    s = s - jnp.max(s, axis=-1, keepdims=True)
    p = jnp.exp(s)                                                 # off-block -> 0.0
    p = p * pl.reciprocal(jnp.sum(p, axis=-1, keepdims=True), approx=False)
    o_r = jnp.dot(p.astype(jnp.bfloat16), v_r,
                  preferred_element_type=jnp.float32)              # (64, 8) f32

    # ---- merge heads back into lanes: (64, 8) -> (16, 32) -------------------------
    attn_in = jnp.concatenate(
        [o_r[h * ROWS:(h + 1) * ROWS, :] for h in range(HEADS)], axis=-1)

    # ---- output projection: one (16,32)@(32,32) push -------------------------------
    attn = jnp.dot(attn_in.astype(jnp.bfloat16), wo_ref[...],
                   preferred_element_type=jnp.float32) + vecs[0:1, :]

    # ---- residual + norm1, FFN, residual + norm2 (all 16 rows at once, f32) --------
    x = _layer_norm(attn + qres_ref[...], vecs[2:3, :], vecs[3:4, :])
    h1 = jnp.dot(x.astype(jnp.bfloat16), w1_ref[...],
                 preferred_element_type=jnp.float32) + b1_ref[...]
    h1 = jnp.maximum(h1, 0.0)
    ff = jnp.dot(h1.astype(jnp.bfloat16), w2_ref[...],
                 preferred_element_type=jnp.float32) + vecs[1:2, :]
    y = _layer_norm(ff + x, vecs[4:5, :], vecs[5:6, :])            # (16, 32) f32

    # ---- lane-dense output store: (16, 32) -> (4, 128), out[i, 32k+j] = y[4k+i, j] --
    out_ref[...] = jnp.concatenate(
        [y[4 * k:4 * (k + 1), :] for k in range(4)], axis=-1)


# ------------------------------- weight packing -----------------------------------
# Called ONCE (outside the per-call path); everything here depends only on params.

def pack_params(params):
    (wq, bq, wk, bk, wv, bv, wo, bo,
     g1, be1, w1, bf1, w2, bf2, g2, be2) = params

    # block-diagonal packed in-projection weight (q/k/v inputs may differ)
    w_qkv = jnp.zeros((3 * EMBED, 3 * EMBED), jnp.float32)
    w_qkv = w_qkv.at[0:EMBED, 0:EMBED].set(wq.T)
    w_qkv = w_qkv.at[EMBED:2 * EMBED, EMBED:2 * EMBED].set(wk.T)
    w_qkv = w_qkv.at[2 * EMBED:, 2 * EMBED:].set(wv.T)
    w_qkv = w_qkv.astype(jnp.bfloat16)                                   # (96, 96)

    b_qkv = jnp.concatenate([bq, bk, bv]).reshape(1, 3 * EMBED)          # (1, 96) f32

    # additive block-diagonal mask over the head-stacked (64, 64) score matrix
    blk = jnp.arange(HROWS) // SEQ
    mask = jnp.where(blk[:, None] == blk[None, :], 0.0, NEG).astype(jnp.float32)

    wo_t = wo.T.astype(jnp.bfloat16)                                     # (32, 32)
    w1_t = w1.T.astype(jnp.bfloat16)                                     # (32, 128)
    b1 = bf1.reshape(1, HIDDEN).astype(jnp.float32)                      # (1, 128)
    w2_t = w2.T.astype(jnp.bfloat16)                                     # (128, 32)
    # packed 1-D params: rows = [b_out, b_ff2, gamma1, beta1, gamma2, beta2]
    vecs = jnp.stack([bo, bf2, g1, be1, g2, be2], axis=0)                # (6, 32) f32
    return (w_qkv, b_qkv, mask, wo_t, w1_t, b1, w2_t, vecs)


# --------------------------------- wrapper -----------------------------------------

@jax.jit
def transformer_block(value, key, query, packed):
    """value/key/query: (L, N, E) float32 (PyTorch seq-first convention)."""
    w_qkv, b_qkv, mask, wo_t, w1_t, b1, w2_t, vecs = packed

    # seq-first -> batch-major token slabs (tiny per-call transposes only)
    q_b = jnp.transpose(query, (1, 0, 2)).reshape(ROWS, EMBED)
    k_b = jnp.transpose(key, (1, 0, 2)).reshape(ROWS, EMBED)
    v_b = jnp.transpose(value, (1, 0, 2)).reshape(ROWS, EMBED)
    x_cat = jnp.concatenate([q_b, k_b, v_b], axis=-1).astype(jnp.bfloat16)  # (16, 96)

    out_flat = pl.pallas_call(
        _kernel,
        out_shape=jax.ShapeDtypeStruct((ROWS * EMBED // 128, 128), jnp.float32),
        compiler_params=pltpu.CompilerParams(vmem_limit_bytes=16 * 1024 * 1024),
        cost_estimate=pl.CostEstimate(flops=750_000, transcendentals=4200,
                                      bytes_accessed=61_440),
    )(x_cat, q_b, w_qkv, b_qkv, mask, wo_t, w1_t, b1, w2_t, vecs)

    # unpack lane-dense slab: out[i, 32k+j] = y[4k+i, j]
    y = jnp.transpose(out_flat.reshape(4, 4, EMBED), (1, 0, 2)).reshape(ROWS, EMBED)
    # batch-major rows -> (N, L, E) -> seq-first (L, N, E)
    return jnp.transpose(y.reshape(BATCH, SEQ, EMBED), (1, 0, 2))


# --------------------------------- reference ----------------------------------------

def reference(value, key, query, params):
    """Pure-JAX f32 mirror of PyTorch TransformerBlock.forward (eval mode)."""
    (wq, bq, wk, bk, wv, bv, wo, bo,
     g1, be1, w1, bf1, w2, bf2, g2, be2) = params
    L, N, E = query.shape

    qp = query @ wq.T + bq
    kp = key @ wk.T + bk
    vp = value @ wv.T + bv

    def split(x):  # (L,N,E) -> (N,H,L,Dh)
        return x.reshape(L, N, HEADS, HEAD_DIM).transpose(1, 2, 0, 3)

    qh, kh, vh = split(qp), split(kp), split(vp)
    s = jnp.einsum('nhld,nhmd->nhlm', qh, kh) / jnp.sqrt(float(HEAD_DIM))
    p = jax.nn.softmax(s, axis=-1)
    o = jnp.einsum('nhlm,nhmd->nhld', p, vh)
    o = o.transpose(2, 0, 1, 3).reshape(L, N, E)
    attn = o @ wo.T + bo

    def ln(x, g, b):
        mu = x.mean(-1, keepdims=True)
        var = ((x - mu) ** 2).mean(-1, keepdims=True)
        return (x - mu) / jnp.sqrt(var + EPS) * g + b

    x = ln(attn + query, g1, be1)
    h1 = jax.nn.relu(x @ w1.T + bf1)
    ff = h1 @ w2.T + bf2
    return ln(ff + x, g2, be2)


def init_params(key):
    ks = jax.random.split(key, 12)
    u = lambda k, shape, a: jax.random.uniform(k, shape, jnp.float32, -a, a)
    inv_e = 1.0 / (EMBED ** 0.5)
    inv_h = 1.0 / (HIDDEN ** 0.5)
    wq = u(ks[0], (EMBED, EMBED), inv_e); bq = u(ks[1], (EMBED,), inv_e)
    wk = u(ks[2], (EMBED, EMBED), inv_e); bk = u(ks[3], (EMBED,), inv_e)
    wv = u(ks[4], (EMBED, EMBED), inv_e); bv = u(ks[5], (EMBED,), inv_e)
    wo = u(ks[6], (EMBED, EMBED), inv_e); bo = u(ks[7], (EMBED,), inv_e)
    g1 = jnp.ones((EMBED,), jnp.float32); be1 = jnp.zeros((EMBED,), jnp.float32)
    w1 = u(ks[8], (HIDDEN, EMBED), inv_e); bf1 = u(ks[9], (HIDDEN,), inv_e)
    w2 = u(ks[10], (EMBED, HIDDEN), inv_h); bf2 = u(ks[11], (EMBED,), inv_h)
    g2 = jnp.ones((EMBED,), jnp.float32); be2 = jnp.zeros((EMBED,), jnp.float32)
    return (wq, bq, wk, bk, wv, bv, wo, bo,
            g1, be1, w1, bf1, w2, bf2, g2, be2)


if __name__ == "__main__":
    root = jax.random.PRNGKey(0)
    kp, kq, kk, kv = jax.random.split(root, 4)
    params = init_params(kp)
    packed = pack_params(params)          # one-time weight packing (hoisted)

    query = jax.random.normal(kq, (SEQ, BATCH, EMBED), jnp.float32)
    key_in = jax.random.normal(kk, (SEQ, BATCH, EMBED), jnp.float32)
    value = jax.random.normal(kv, (SEQ, BATCH, EMBED), jnp.float32)

    out = transformer_block(value, key_in, query, packed)
    out = jax.block_until_ready(out)

    ref = reference(value, key_in, query, params)
    assert out.shape == (SEQ, BATCH, EMBED)
    # Tolerance tightened from 5e-2 -> 3e-2: softmax now uses the exact reciprocal;
    # remaining error is from bf16 MXU inputs (f32 accumulation / norms / softmax).
    assert jnp.allclose(out, ref, atol=3e-2, rtol=3e-2), \
        f"max abs err = {jnp.max(jnp.abs(out - ref))}"
    print("KERNEL_OK")
</pallas_src>

<mosaic_0001>
module attributes {stable_mosaic.version = 11 : i64} {
  func.func @_kernel(%arg0: memref<16x96xbf16, #tpu.memory_space<vmem>>, %arg1: memref<16x32xf32, #tpu.memory_space<vmem>>, %arg2: memref<96x96xbf16, #tpu.memory_space<vmem>>, %arg3: memref<1x96xf32, #tpu.memory_space<vmem>>, %arg4: memref<64x64xf32, #tpu.memory_space<vmem>>, %arg5: memref<32x32xbf16, #tpu.memory_space<vmem>>, %arg6: memref<32x128xbf16, #tpu.memory_space<vmem>>, %arg7: memref<1x128xf32, #tpu.memory_space<vmem>>, %arg8: memref<128x32xbf16, #tpu.memory_space<vmem>>, %arg9: memref<6x32xf32, #tpu.memory_space<vmem>>, %arg10: memref<4x128xf32, #tpu.memory_space<vmem>>) attributes {dimension_semantics = [], scalar_prefetch = 0 : i64, scratch_operands = 0 : i64, tpu.core_type = #tpu.core_type<tc>} {
    %c0 = arith.constant 0 : index
    %c0_0 = arith.constant 0 : index
    %0 = vector.load %arg9[%c0, %c0_0] : memref<6x32xf32, #tpu.memory_space<vmem>>, vector<6x32xf32>
    %c0_1 = arith.constant 0 : index
    %c0_2 = arith.constant 0 : index
    %1 = vector.load %arg0[%c0_1, %c0_2] : memref<16x96xbf16, #tpu.memory_space<vmem>>, vector<16x96xbf16>
    %c0_3 = arith.constant 0 : index
    %c0_4 = arith.constant 0 : index
    %2 = vector.load %arg2[%c0_3, %c0_4] : memref<96x96xbf16, #tpu.memory_space<vmem>>, vector<96x96xbf16>
    %cst = arith.constant dense<0.000000e+00> : vector<16x96xf32>
    %3 = tpu.matmul %1, %2, %cst {dimension_numbers = #tpu.dot_dimension_numbers<[1], [0], [0], [1], [0, 0, 1, 1], [], []>} : vector<16x96xbf16>, vector<96x96xbf16>, vector<16x96xf32> -> vector<16x96xf32>
    %c0_5 = arith.constant 0 : index
    %c0_6 = arith.constant 0 : index
    %4 = vector.load %arg3[%c0_5, %c0_6] : memref<1x96xf32, #tpu.memory_space<vmem>>, vector<1x96xf32>
    %5 = vector.broadcast %4 : vector<1x96xf32> to vector<16x96xf32>
    %6 = arith.addf %3, %5 : vector<16x96xf32>
    %7 = arith.truncf %6 : vector<16x96xf32> to vector<16x96xbf16>
    %8 = vector.extract_strided_slice %7 {offsets = [0, 0], sizes = [16, 8], strides = [1, 1]} : vector<16x96xbf16> to vector<16x8xbf16>
    %9 = vector.extract_strided_slice %7 {offsets = [0, 8], sizes = [16, 8], strides = [1, 1]} : vector<16x96xbf16> to vector<16x8xbf16>
    %10 = vector.extract_strided_slice %7 {offsets = [0, 16], sizes = [16, 8], strides = [1, 1]} : vector<16x96xbf16> to vector<16x8xbf16>
    %11 = vector.extract_strided_slice %7 {offsets = [0, 24], sizes = [16, 8], strides = [1, 1]} : vector<16x96xbf16> to vector<16x8xbf16>
    %12 = tpu.concatenate %8, %9, %10, %11 in 0 : vector<16x8xbf16>, vector<16x8xbf16>, vector<16x8xbf16>, vector<16x8xbf16> -> vector<64x8xbf16>
    %13 = vector.extract_strided_slice %7 {offsets = [0, 32], sizes = [16, 8], strides = [1, 1]} : vector<16x96xbf16> to vector<16x8xbf16>
    %14 = vector.extract_strided_slice %7 {offsets = [0, 40], sizes = [16, 8], strides = [1, 1]} : vector<16x96xbf16> to vector<16x8xbf16>
    %15 = vector.extract_strided_slice %7 {offsets = [0, 48], sizes = [16, 8], strides = [1, 1]} : vector<16x96xbf16> to vector<16x8xbf16>
    %16 = vector.extract_strided_slice %7 {offsets = [0, 56], sizes = [16, 8], strides = [1, 1]} : vector<16x96xbf16> to vector<16x8xbf16>
    %17 = tpu.concatenate %13, %14, %15, %16 in 0 : vector<16x8xbf16>, vector<16x8xbf16>, vector<16x8xbf16>, vector<16x8xbf16> -> vector<64x8xbf16>
    %18 = vector.extract_strided_slice %7 {offsets = [0, 64], sizes = [16, 8], strides = [1, 1]} : vector<16x96xbf16> to vector<16x8xbf16>
    %19 = vector.extract_strided_slice %7 {offsets = [0, 72], sizes = [16, 8], strides = [1, 1]} : vector<16x96xbf16> to vector<16x8xbf16>
    %20 = vector.extract_strided_slice %7 {offsets = [0, 80], sizes = [16, 8], strides = [1, 1]} : vector<16x96xbf16> to vector<16x8xbf16>
    %21 = vector.extract_strided_slice %7 {offsets = [0, 88], sizes = [16, 8], strides = [1, 1]} : vector<16x96xbf16> to vector<16x8xbf16>
    %22 = tpu.concatenate %18, %19, %20, %21 in 0 : vector<16x8xbf16>, vector<16x8xbf16>, vector<16x8xbf16>, vector<16x8xbf16> -> vector<64x8xbf16>
    "tpu.trace_start"() <{level = 10 : i32, message = "ld,md->lm"}> : () -> ()
    %cst_7 = arith.constant dense<0.000000e+00> : vector<64x64xf32>
    %23 = tpu.matmul %12, %17, %cst_7 {dimension_numbers = #tpu.dot_dimension_numbers<[1], [1], [0], [0], [0, 0, 1, 0], [], []>} : vector<64x8xbf16>, vector<64x8xbf16>, vector<64x64xf32> -> vector<64x64xf32>
    "tpu.trace_stop"() : () -> ()
    %cst_8 = arith.constant 0.353553385 : f32
    %24 = vector.broadcast %cst_8 : f32 to vector<64x64xf32>
    %25 = arith.mulf %23, %24 : vector<64x64xf32>
    %c0_9 = arith.constant 0 : index
    %c0_10 = arith.constant 0 : index
    %26 = vector.load %arg4[%c0_9, %c0_10] : memref<64x64xf32, #tpu.memory_space<vmem>>, vector<64x64xf32>
    %27 = arith.addf %25, %26 : vector<64x64xf32>
    %cst_11 = arith.constant dense<0xFF800000> : vector<64xf32>
    %28 = vector.multi_reduction <maximumf>, %27, %cst_11 [1] : vector<64x64xf32> to vector<64xf32>
    %29 = vector.shape_cast %28 : vector<64xf32> to vector<64x1xf32>
    %30 = vector.broadcast %29 : vector<64x1xf32> to vector<64x64xf32>
    %31 = arith.subf %27, %30 : vector<64x64xf32>
    %32 = math.exp %31 : vector<64x64xf32>
    %cst_12 = arith.constant dense<0.000000e+00> : vector<64xf32>
    %33 = vector.multi_reduction <add>, %32, %cst_12 [1] : vector<64x64xf32> to vector<64xf32>
    %34 = vector.shape_cast %33 : vector<64xf32> to vector<64x1xf32>
    %35 = tpu.reciprocal %34 : vector<64x1xf32> -> vector<64x1xf32>
    %36 = vector.broadcast %35 : vector<64x1xf32> to vector<64x64xf32>
    %37 = arith.mulf %32, %36 : vector<64x64xf32>
    %38 = arith.truncf %37 : vector<64x64xf32> to vector<64x64xbf16>
    %cst_13 = arith.constant dense<0.000000e+00> : vector<64x8xf32>
    %39 = tpu.matmul %38, %22, %cst_13 {dimension_numbers = #tpu.dot_dimension_numbers<[1], [0], [0], [1], [0, 0, 1, 1], [], []>} : vector<64x64xbf16>, vector<64x8xbf16>, vector<64x8xf32> -> vector<64x8xf32>
    %40 = vector.extract_strided_slice %39 {offsets = [0, 0], sizes = [16, 8], strides = [1, 1]} : vector<64x8xf32> to vector<16x8xf32>
    %41 = vector.extract_strided_slice %39 {offsets = [16, 0], sizes = [16, 8], strides = [1, 1]} : vector<64x8xf32> to vector<16x8xf32>
    %42 = vector.extract_strided_slice %39 {offsets = [32, 0], sizes = [16, 8], strides = [1, 1]} : vector<64x8xf32> to vector<16x8xf32>
    %43 = vector.extract_strided_slice %39 {offsets = [48, 0], sizes = [16, 8], strides = [1, 1]} : vector<64x8xf32> to vector<16x8xf32>
    %44 = tpu.concatenate %40, %41, %42, %43 in 1 : vector<16x8xf32>, vector<16x8xf32>, vector<16x8xf32>, vector<16x8xf32> -> vector<16x32xf32>
    %45 = arith.truncf %44 : vector<16x32xf32> to vector<16x32xbf16>
    %c0_14 = arith.constant 0 : index
    %c0_15 = arith.constant 0 : index
    %46 = vector.load %arg5[%c0_14, %c0_15] : memref<32x32xbf16, #tpu.memory_space<vmem>>, vector<32x32xbf16>
    %cst_16 = arith.constant dense<0.000000e+00> : vector<16x32xf32>
    %47 = tpu.matmul %45, %46, %cst_16 {dimension_numbers = #tpu.dot_dimension_numbers<[1], [0], [0], [1], [0, 0, 1, 1], [], []>} : vector<16x32xbf16>, vector<32x32xbf16>, vector<16x32xf32> -> vector<16x32xf32>
    %48 = vector.extract_strided_slice %0 {offsets = [0, 0], sizes = [1, 32], strides = [1, 1]} : vector<6x32xf32> to vector<1x32xf32>
    %49 = vector.broadcast %48 : vector<1x32xf32> to vector<16x32xf32>
    %50 = arith.addf %47, %49 : vector<16x32xf32>
    %c0_17 = arith.constant 0 : index
    %c0_18 = arith.constant 0 : index
    %51 = vector.load %arg1[%c0_17, %c0_18] : memref<16x32xf32, #tpu.memory_space<vmem>>, vector<16x32xf32>
    %52 = arith.addf %50, %51 : vector<16x32xf32>
    %53 = vector.extract_strided_slice %0 {offsets = [2, 0], sizes = [1, 32], strides = [1, 1]} : vector<6x32xf32> to vector<1x32xf32>
    %54 = vector.extract_strided_slice %0 {offsets = [3, 0], sizes = [1, 32], strides = [1, 1]} : vector<6x32xf32> to vector<1x32xf32>
    %cst_19 = arith.constant dense<0.000000e+00> : vector<16xf32>
    %55 = vector.multi_reduction <add>, %52, %cst_19 [1] : vector<16x32xf32> to vector<16xf32>
    %56 = vector.shape_cast %55 : vector<16xf32> to vector<16x1xf32>
    %cst_20 = arith.constant 3.200000e+01 : f32
    %57 = vector.broadcast %cst_20 : f32 to vector<16x1xf32>
    %58 = arith.divf %56, %57 : vector<16x1xf32>
    %59 = vector.broadcast %58 : vector<16x1xf32> to vector<16x32xf32>
    %60 = arith.subf %52, %59 : vector<16x32xf32>
    %61 = arith.mulf %60, %60 : vector<16x32xf32>
    %cst_21 = arith.constant dense<0.000000e+00> : vector<16xf32>
    %62 = vector.multi_reduction <add>, %61, %cst_21 [1] : vector<16x32xf32> to vector<16xf32>
    %63 = vector.shape_cast %62 : vector<16xf32> to vector<16x1xf32>
    %cst_22 = arith.constant 3.200000e+01 : f32
    %64 = vector.broadcast %cst_22 : f32 to vector<16x1xf32>
    %65 = arith.divf %63, %64 : vector<16x1xf32>
    %66 = vector.broadcast %58 : vector<16x1xf32> to vector<16x32xf32>
    %67 = arith.subf %52, %66 : vector<16x32xf32>
    %cst_23 = arith.constant 9.99999974E-6 : f32
    %68 = vector.broadcast %cst_23 : f32 to vector<16x1xf32>
    %69 = arith.addf %65, %68 : vector<16x1xf32>
    %70 = math.rsqrt %69 : vector<16x1xf32>
    %71 = vector.broadcast %70 : vector<16x1xf32> to vector<16x32xf32>
    %72 = arith.mulf %67, %71 : vector<16x32xf32>
    %73 = vector.broadcast %53 : vector<1x32xf32> to vector<16x32xf32>
    %74 = arith.mulf %72, %73 : vector<16x32xf32>
    %75 = vector.broadcast %54 : vector<1x32xf32> to vector<16x32xf32>
    %76 = arith.addf %74, %75 : vector<16x32xf32>
    %77 = arith.truncf %76 : vector<16x32xf32> to vector<16x32xbf16>
    %c0_24 = arith.constant 0 : index
    %c0_25 = arith.constant 0 : index
    %78 = vector.load %arg6[%c0_24, %c0_25] : memref<32x128xbf16, #tpu.memory_space<vmem>>, vector<32x128xbf16>
    %cst_26 = arith.constant dense<0.000000e+00> : vector<16x128xf32>
    %79 = tpu.matmul %77, %78, %cst_26 {dimension_numbers = #tpu.dot_dimension_numbers<[1], [0], [0], [1], [0, 0, 1, 1], [], []>} : vector<16x32xbf16>, vector<32x128xbf16>, vector<16x128xf32> -> vector<16x128xf32>
    %c0_27 = arith.constant 0 : index
    %c0_28 = arith.constant 0 : index
    %80 = vector.load %arg7[%c0_27, %c0_28] : memref<1x128xf32, #tpu.memory_space<vmem>>, vector<1x128xf32>
    %81 = vector.broadcast %80 : vector<1x128xf32> to vector<16x128xf32>
    %82 = arith.addf %79, %81 : vector<16x128xf32>
    %cst_29 = arith.constant 0.000000e+00 : f32
    %83 = vector.broadcast %cst_29 : f32 to vector<16x128xf32>
    %84 = arith.maximumf %82, %83 : vector<16x128xf32>
    %85 = arith.truncf %84 : vector<16x128xf32> to vector<16x128xbf16>
    %c0_30 = arith.constant 0 : index
    %c0_31 = arith.constant 0 : index
    %86 = vector.load %arg8[%c0_30, %c0_31] : memref<128x32xbf16, #tpu.memory_space<vmem>>, vector<128x32xbf16>
    %cst_32 = arith.constant dense<0.000000e+00> : vector<16x32xf32>
    %87 = tpu.matmul %85, %86, %cst_32 {dimension_numbers = #tpu.dot_dimension_numbers<[1], [0], [0], [1], [0, 0, 1, 1], [], []>} : vector<16x128xbf16>, vector<128x32xbf16>, vector<16x32xf32> -> vector<16x32xf32>
    %88 = vector.extract_strided_slice %0 {offsets = [1, 0], sizes = [1, 32], strides = [1, 1]} : vector<6x32xf32> to vector<1x32xf32>
    %89 = vector.broadcast %88 : vector<1x32xf32> to vector<16x32xf32>
    %90 = arith.addf %87, %89 : vector<16x32xf32>
    %91 = arith.addf %90, %76 : vector<16x32xf32>
    %92 = vector.extract_strided_slice %0 {offsets = [4, 0], sizes = [1, 32], strides = [1, 1]} : vector<6x32xf32> to vector<1x32xf32>
    %93 = vector.extract_strided_slice %0 {offsets = [5, 0], sizes = [1, 32], strides = [1, 1]} : vector<6x32xf32> to vector<1x32xf32>
    %cst_33 = arith.constant dense<0.000000e+00> : vector<16xf32>
    %94 = vector.multi_reduction <add>, %91, %cst_33 [1] : vector<16x32xf32> to vector<16xf32>
    %95 = vector.shape_cast %94 : vector<16xf32> to vector<16x1xf32>
    %cst_34 = arith.constant 3.200000e+01 : f32
    %96 = vector.broadcast %cst_34 : f32 to vector<16x1xf32>
    %97 = arith.divf %95, %96 : vector<16x1xf32>
    %98 = vector.broadcast %97 : vector<16x1xf32> to vector<16x32xf32>
    %99 = arith.subf %91, %98 : vector<16x32xf32>
    %100 = arith.mulf %99, %99 : vector<16x32xf32>
    %cst_35 = arith.constant dense<0.000000e+00> : vector<16xf32>
    %101 = vector.multi_reduction <add>, %100, %cst_35 [1] : vector<16x32xf32> to vector<16xf32>
    %102 = vector.shape_cast %101 : vector<16xf32> to vector<16x1xf32>
    %cst_36 = arith.constant 3.200000e+01 : f32
    %103 = vector.broadcast %cst_36 : f32 to vector<16x1xf32>
    %104 = arith.divf %102, %103 : vector<16x1xf32>
    %105 = vector.broadcast %97 : vector<16x1xf32> to vector<16x32xf32>
    %106 = arith.subf %91, %105 : vector<16x32xf32>
    %cst_37 = arith.constant 9.99999974E-6 : f32
    %107 = vector.broadcast %cst_37 : f32 to vector<16x1xf32>
    %108 = arith.addf %104, %107 : vector<16x1xf32>
    %109 = math.rsqrt %108 : vector<16x1xf32>
    %110 = vector.broadcast %109 : vector<16x1xf32> to vector<16x32xf32>
    %111 = arith.mulf %106, %110 : vector<16x32xf32>
    %112 = vector.broadcast %92 : vector<1x32xf32> to vector<16x32xf32>
    %113 = arith.mulf %111, %112 : vector<16x32xf32>
    %114 = vector.broadcast %93 : vector<1x32xf32> to vector<16x32xf32>
    %115 = arith.addf %113, %114 : vector<16x32xf32>
    %116 = vector.extract_strided_slice %115 {offsets = [0, 0], sizes = [4, 32], strides = [1, 1]} : vector<16x32xf32> to vector<4x32xf32>
    %117 = vector.extract_strided_slice %115 {offsets = [4, 0], sizes = [4, 32], strides = [1, 1]} : vector<16x32xf32> to vector<4x32xf32>
    %118 = vector.extract_strided_slice %115 {offsets = [8, 0], sizes = [4, 32], strides = [1, 1]} : vector<16x32xf32> to vector<4x32xf32>
    %119 = vector.extract_strided_slice %115 {offsets = [12, 0], sizes = [4, 32], strides = [1, 1]} : vector<16x32xf32> to vector<4x32xf32>
    %120 = tpu.concatenate %116, %117, %118, %119 in 1 : vector<4x32xf32>, vector<4x32xf32>, vector<4x32xf32>, vector<4x32xf32> -> vector<4x128xf32>
    %c0_38 = arith.constant 0 : index
    %c0_39 = arith.constant 0 : index
    %121 = vector.load %arg10[%c0_38, %c0_39] : memref<4x128xf32, #tpu.memory_space<vmem>>, vector<4x128xf32>
    tpu.vector_store %arg10[%c0_38, %c0_39], %120 {strides = array<i32>} : memref<4x128xf32, #tpu.memory_space<vmem>>, vector<4x128xf32>,
    return
  }
}

</mosaic_0001>

<bundles_post_ra>
// kernel: transformer_block.1
= control target key start
LH: loop header
LB: loop body
LE: loop exit
PB: predicated region body
PF: predicated region fallthrough
CT: control target
= control target key end

     0   :  { %v1081_v0 = vmov 0.0   ;;  %vm1082_vm0 = vmmov 0   ;;  %vm99_vm1 = vcmask 785408   ;;  %vm160_vm2 = vcmask 64512   ;;  %s1085_s29 = smov 112   ;;  %s1087_s26 = smov 64   ;;  %s1369_s2 = inlined_call_operand.vmem [shape: bf16[96,96], index: 2, kind: input, shape index: {}]   ;;  %s1370_s0 = inlined_call_operand.vmem [shape: bf16[16,96], index: 0, kind: input, shape index: {}]   ;;  %s1371_s3 = inlined_call_operand.vmem [shape: f32[1,96], index: 3, kind: input, shape index: {}]   ;;  %s1372_s4 = inlined_call_operand.vmem [shape: f32[64,64], index: 4, kind: input, shape index: {}]   ;;  %s1373_s5 = inlined_call_operand.vmem [shape: bf16[32,32], index: 5, kind: input, shape index: {}]   ;;  %s1374_s9 = inlined_call_operand.vmem [shape: f32[6,32], index: 9, kind: input, shape index: {}]   ;;  %s1375_s1 = inlined_call_operand.vmem [shape: f32[16,32], index: 1, kind: input, shape index: {}]   ;;  %s1376_s6 = inlined_call_operand.vmem [shape: bf16[32,128], index: 6, kind: input, shape index: {}]   ;;  %s1377_s8 = inlined_call_operand.vmem [shape: bf16[128,32], index: 8, kind: input, shape index: {}]   ;;  %s1378_s7 = inlined_call_operand.vmem [shape: f32[1,128], index: 7, kind: input, shape index: {}]   ;;  %s1379_s10 = inlined_call_operand.vmem [shape: f32[4,128], index: 10, kind: output, shape index: {}]  }
   0x1   :  { %908 = vmatprep.subr.bf16.mxu0 %v1081_v0  ;;  %v1022_v1 = vld [vmem:[%s1369_s2 + $0x28] sm:$0xff]   ;;  %920 = vmatprep.mubr.msk.bf16.mxu0 %vm1082_vm0, %v1081_v0  ;;  %v1023_v2 = vld [vmem:[%s1369_s2 + $0x20] sm:$0xff]   ;;  %v1024_v3 = vld [vmem:[%s1369_s2 + $0x18] sm:$0xff]   ;;  %vm274_vm3 = vcmask 523264   ;;  %s1090_s30 = smov 16   ;;  %vm482_vm4 = vcmask 130048  }
   0x2   :  { %909 = vmatpush3.bf16.msra.mxu0 %v1022_v1  ;;  %v1025_v4 = vld [vmem:[%s1369_s2 + $0x10] sm:$0xff]   ;;  %v1026_v5 = vld [vmem:[%s1369_s2 + $0x8] sm:$0xff]   ;;  %v1027_v6 = vld [vmem:[%s1369_s2] sm:$0xff]   ;;  %s1083_s2 = smov 120   ;;  %vm485_vm5 = vcmask 195584   ;;  %vm509_vm6 = vcmask 261120  }
   0x3   :  { %910 = vmatprep.subr.bf16.mxu0 %v1081_v0  ;;  %v1028_v7 = vld [vmem:[%s1370_s0] sm:$0xff]   ;;  %s1084_s0 = smov 104   ;;  %v261_v32 = vld [vmem:[%s1372_s4 + $0x18] sm:$0xff]  ;;  %v259_v37 = vld [vmem:[%s1372_s4 + $0x8] sm:$0xff] }
   0x4   :  { %v838_v9 = vld [vmem:[%s1371_s3] ss:$0 sm:$0xff]  ;;  %s1086_s3 = smov 96   ;;  %v260_v41 = vld [vmem:[%s1372_s4 + $0x10] sm:$0xff]  ;;  %v263_v53 = vld [vmem:[%s1372_s4 + $0x28] sm:$0xff] }
   0x5   :  { %v258_v29 = vld [vmem:[%s1372_s4] sm:$0xff]  ;;  %v264_v58 = vld [vmem:[%s1372_s4 + $0x30] sm:$0xff]  ;;  %v265_v59 = vld [vmem:[%s1372_s4 + $0x38] sm:$0xff] }
   0x6   :  { %911 = vmatpush3.bf16.msra.mxu0 %v1023_v2  ;;  %v262_v50 = vld [vmem:[%s1372_s4 + $0x20] sm:$0xff] }
   0x7   :  { %912 = vmatprep.subr.bf16.mxu0 %v1081_v0 }
   0xa   :  { %913 = vmatpush3.bf16.msra.mxu0 %v1024_v3 }
   0xb   :  { %914 = vmatprep.subr.bf16.mxu0 %v1081_v0 }
   0xe   :  { %915 = vmatpush3.bf16.msra.mxu0 %v1025_v4 }
   0xf   :  { %916 = vmatprep.subr.bf16.mxu0 %v1081_v0 }
  0x12   :  { %917 = vmatpush3.bf16.msra.mxu0 %v1026_v5 }
  0x13   :  { %918 = vmatprep.subr.bf16.mxu0 %v1081_v0 }
  0x16   :  { %919 = vmatpush3.bf16.msra.mxu0 %v1027_v6 }
  0x19   :  { %921 = vmatmul.mubr.msk.bf16.vlgmr.msra.gmra.mxu0 %vm99_vm1, %v1028_v7 }
  0xd9   :  { %v137_v8 = vpop.f32.mrf.mxu0 }
  0xda   :  { %v138_v12 = vadd.f32 %v838_v9, %v137_v8 }
  0xdb   :  { %v922_v10 = vpop.f32.mrf.mxu0 }
  0xdd   :  { %v140_v11 = vpop.f32.mrf.mxu0 }
  0xde   :  { %v141_v13 = vadd.f32 %v838_v9, %v140_v11 }
  0xdf   :  { %v923_v14 = vpop.f32.mrf.mxu0 }
  0xe0   :  { %v1180_v15 = vpack.c.bf16 %v141_v13, %v138_v12 }
  0xe2   :  { %146 = vrot.lane.b32.xlu1 %v1180_v15, %s1083_s2  ;;  %150 = vrot.lane.b32.xlu0 %v1180_v15, %s1084_s0  ;;  %s1088_s0 = smov 8  }
  0xe3   :  { %932 = vmatprep.mubr.msk.bf16.mxu1 %vm160_vm2, %v1180_v15 }
  0xe6   :  { %148 = vrot.lane.b32.xlu0 %v1180_v15, %s1085_s29  ;;  %s1089_s29 = smov 24  }
 0x154   :  { %v1187_v16 = vpop.permute.xlu0 %150  ;;  %v1191_v17 = vpop.permute.xlu1 %146 }
 0x155   :  { %158 = vrot.lane.b32.xlu1 %v1187_v16, %s1086_s3 }
 0x158   :  { %v1193_v18 = vpop.permute.xlu0 %148 }
 0x159   :  { %154 = vrot.lane.b32.xlu1 %v1191_v17, %s1086_s3  ;;  %156 = vrot.lane.b32.xlu0 %v1193_v18, %s1086_s3 }
 0x15d   :  { %152 = vrot.lane.b32.xlu0 %v1180_v15, %s1086_s3 }
 0x1c7   :  { %v159_v19 = vpop.permute.xlu1 %158 }
 0x1c8   :  { %992 = vmatprep.subr.msk.bf16.mxu1 %vm160_vm2, %v159_v19  ;;  %v183_v20 = vsel %vm160_vm2, %v159_v19, 0 }
 0x1c9   :  { %925 = vmatpush3.bf16.xpose.msra.mxu1 %v183_v20 }
 0x1cb   :  { %v157_v21 = vpop.permute.xlu0 %156  ;;  %v155_v23 = vpop.permute.xlu1 %154 }
 0x1cc   :  { %993 = vmatprep.subr.msk.bf16.mxu1 %vm160_vm2, %v157_v21  ;;  %v180_v22 = vsel %vm160_vm2, %v157_v21, 0  ;;  %v177_v24 = vsel %vm160_vm2, %v155_v23, 0 }
 0x1cf   :  { %v153_v25 = vpop.permute.xlu0 %152 }
 0x1d0   :  { %v174_v26 = vsel %vm160_vm2, %v153_v25, 0 }
 0x1d1   :  { %927 = vmatpush3.bf16.xpose.msra.mxu1 %v180_v22 }
 0x1d2   :  { %994 = vmatprep.subr.msk.bf16.mxu1 %vm160_vm2, %v155_v23 }
 0x1d9   :  { %929 = vmatpush3.bf16.xpose.msra.mxu1 %v177_v24 }
 0x1da   :  { %995 = vmatprep.subr.msk.bf16.mxu1 %vm160_vm2, %v153_v25 }
 0x1e1   :  { %931 = vmatpush3.bf16.xpose.msra.mxu1 %v174_v26 }
 0x1e2   :  { %972 = vmatprep.subr.bf16.mxu1 %v1081_v0 }
 0x1e8   :  { %933 = vmatmul.mubr.msk.bf16.vlgmr.msra.gmra.mxu1 %vm160_vm2, %v1191_v17 }
 0x1e9   :  { %936 = vmatprep.mubr.msk.bf16.mxu1 %vm160_vm2, %v1193_v18 }
 0x1f0   :  { %937 = vmatmul.mubr.msk.bf16.gmra.mxu1 %vm160_vm2, %v1187_v16 }
 0x1f1   :  { %988 = vmatprep.mubr.msk.bf16.mxu1 %vm1082_vm0, %v1081_v0 }
 0x2a8   :  { %v934_v27 = vpop.f32.mrf.mxu1 }
 0x2a9   :  { %v252_v35 = vmul.f32 0.35355338, %v934_v27 }
 0x2aa   :  { %v219_v28 = vpop.f32.mrf.mxu1 }
 0x2ab   :  { %v250_v30 = vmul.f32 0.35355338, %v219_v28  ;;  %v268_v45 = vadd.f32 %v260_v41, %v252_v35 }
 0x2ac   :  { %v935_v31 = vpop.f32.mrf.mxu1 }
 0x2ad   :  { %v253_v33 = vmul.f32 0.35355338, %v935_v31  ;;  %v266_v34 = vadd.f32 %v258_v29, %v250_v30  ;;  %v281_v52 = vsel %vm274_vm3, %v268_v45, -inf }
 0x2ae   :  { %v222_v36 = vpop.f32.mrf.mxu1 }
 0x2af   :  { %v251_v38 = vmul.f32 0.35355338, %v222_v36  ;;  %v275_v39 = vsel %vm274_vm3, %v266_v34, -inf  ;;  %v269_v40 = vadd.f32 %v261_v32, %v253_v33 }
 0x2b0   :  { %276 = vmax.xlane.f32.xlu1 %v275_v39  ;;  %v938_v42 = vpop.f32.mrf.mxu1 }
 0x2b1   :  { %v267_v43 = vadd.f32 %v259_v37, %v251_v38  ;;  %v284_v47 = vsel %vm274_vm3, %v269_v40, -inf  ;;  %v256_v54 = vmul.f32 0.35355338, %v938_v42 }
 0x2b2   :  { %v235_v44 = vpop.f32.mrf.mxu1 }
 0x2b3   :  { %v254_v46 = vmul.f32 0.35355338, %v235_v44  ;;  %v278_v48 = vsel %vm274_vm3, %v267_v43, -inf  ;;  %v272_v63 = vadd.f32 %v264_v58, %v256_v54 }
 0x2b4   :  { %285 = vmax.xlane.f32.xlu1 %v284_v47  ;;  %279 = vmax.xlane.f32.xlu0 %v278_v48  ;;  %v939_v49 = vpop.f32.mrf.mxu1 }
 0x2b5   :  { %v257_v55 = vmul.f32 0.35355338, %v939_v49  ;;  %v270_v57 = vadd.f32 %v262_v50, %v254_v46  ;;  %v293_v2 = vsel %vm274_vm3, %v272_v63, -inf }
 0x2b6   :  { %v238_v51 = vpop.f32.mrf.mxu1 }
 0x2b7   :  { %v255_v56 = vmul.f32 0.35355338, %v238_v51  ;;  %v287_v61 = vsel %vm274_vm3, %v270_v57, -inf  ;;  %v273_v1 = vadd.f32 %v265_v59, %v257_v55 }
 0x2b8   :  { %282 = vmax.xlane.f32.xlu0 %v281_v52 }
 0x2b9   :  { %v271_v60 = vadd.f32 %v263_v53, %v255_v56  ;;  %v296_v3 = vsel %vm274_vm3, %v273_v1, -inf }
 0x2bb   :  { %v290_v62 = vsel %vm274_vm3, %v271_v60, -inf }
 0x2bc   :  { %288 = vmax.xlane.f32.xlu0 %v287_v61  ;;  %291 = vmax.xlane.f32.xlu1 %v290_v62 }
 0x2c0   :  { %294 = vmax.xlane.f32.xlu0 %v293_v2  ;;  %297 = vmax.xlane.f32.xlu1 %v296_v3 }
 0x2d1   :  { %371 = vrot.lane.b32.xlu1 %v1193_v18, %s1087_s26 }
 0x2d6   :  { %373 = vrot.lane.b32.xlu0 %v1187_v16, %s1087_s26 }
 0x339   :  { %v277_v4 = vpop.xlane.xlu1 %276 }
 0x33a   :  { %v299_v9 = vsub.f32 %v266_v34, %v277_v4 }
 0x33c   :  { %v307_v14 = vmul.f32 1.442695, %v299_v9 }
 0x33d   :  { %v286_v5 = vpop.xlane.xlu1 %285  ;;  %v280_v6 = vpop.xlane.xlu0 %279 }
 0x33e   :  { %v302_v7 = vsub.f32 %v269_v40, %v286_v5  ;;  %v300_v8 = vsub.f32 %v267_v43, %v280_v6 }
 0x340   :  { %v313_v10 = vmul.f32 1.442695, %v302_v7  ;;  %v309_v11 = vmul.f32 1.442695, %v300_v8 }
 0x341   :  { %v283_v12 = vpop.xlane.xlu0 %282 }
 0x342   :  { %1041 = vpow2.f32 %v313_v10  ;;  %v301_v13 = vsub.f32 %v268_v45, %v283_v12 }
 0x343   :  { %1043 = vpow2.f32 %v309_v11 }
 0x344   :  { %v311_v19 = vmul.f32 1.442695, %v301_v13  ;;  %v1029_v13 = vld [vmem:[%s1373_s5 + $0x8] sm:$0xff]  }
 0x345   :  { %v289_v20 = vpop.xlane.xlu0 %288  ;;  %v292_v21 = vpop.xlane.xlu1 %291 }
 0x346   :  { %1045 = vpow2.f32 %v311_v19  ;;  %v303_v18 = vsub.f32 %v270_v57, %v289_v20  ;;  %v304_v16 = vsub.f32 %v271_v60, %v292_v21  ;;  %v1030_v20 = vld [vmem:[%s1373_s5] sm:$0xff]  }
 0x347   :  { %1047 = vpow2.f32 %v307_v14 }
 0x348   :  { %v315_v26 = vmul.f32 1.442695, %v303_v18  ;;  %v317_v29 = vmul.f32 1.442695, %v304_v16 }
 0x349   :  { %v295_v22 = vpop.xlane.xlu0 %294  ;;  %v298_v23 = vpop.xlane.xlu1 %297 }
 0x34a   :  { %v305_v24 = vsub.f32 %v272_v63, %v295_v22  ;;  %v306_v25 = vsub.f32 %v273_v1, %v298_v23 }
 0x34c   :  { %v319_v27 = vmul.f32 1.442695, %v305_v24  ;;  %v321_v28 = vmul.f32 1.442695, %v306_v25 }
 0x34d   :  { %v374_v30 = vpop.permute.xlu0 %373  ;;  %v372_v32 = vpop.permute.xlu1 %371 }
 0x34e   :  { %1049 = vpow2.f32 %v319_v27  ;;  %940 = vmatprep.subr.bf16.mxu0 %v374_v30 }
 0x34f   :  { %v1042_v31 = vpop.eup %1041  ;;  %1051 = vpow2.f32 %v321_v28  ;;  %941 = vmatpush3.bf16.msra.mxu0 %v374_v30 }
 0x350   :  { %1053 = vpow2.f32 %v315_v26  ;;  %942 = vmatprep.subr.bf16.mxu0 %v372_v32  ;;  %v332_v33 = vsel %vm274_vm3, %v1042_v31, 0.0  ;;  %v1044_v34 = vpop.eup %1043 }
 0x351   :  { %1055 = vpow2.f32 %v317_v29  ;;  %333 = vadd.xlane.f32.xlu1 %v332_v33  ;;  %v326_v37 = vsel %vm274_vm3, %v1044_v34, 0.0 }
 0x353   :  { %v1046_v35 = vpop.eup %1045  ;;  %943 = vmatpush3.bf16.msra.mxu0 %v372_v32 }
 0x354   :  { %v329_v36 = vsel %vm274_vm3, %v1046_v35, 0.0  ;;  %v1048_v38 = vpop.eup %1047 }
 0x355   :  { %330 = vadd.xlane.f32.xlu0 %v329_v36  ;;  %327 = vadd.xlane.f32.xlu1 %v326_v37  ;;  %v323_v39 = vsel %vm274_vm3, %v1048_v38, 0.0 }
 0x359   :  { %324 = vadd.xlane.f32.xlu0 %v323_v39 }
 0x35b   :  { %v1050_v40 = vpop.eup %1049 }
 0x35c   :  { %v1052_v41 = vpop.eup %1051  ;;  %v341_v42 = vsel %vm274_vm3, %v1050_v40, 0.0 }
 0x35d   :  { %v1054_v43 = vpop.eup %1053  ;;  %342 = vadd.xlane.f32.xlu0 %v341_v42  ;;  %v344_v44 = vsel %vm274_vm3, %v1052_v41, 0.0 }
 0x35e   :  { %v1056_v45 = vpop.eup %1055  ;;  %345 = vadd.xlane.f32.xlu1 %v344_v44  ;;  %v335_v46 = vsel %vm274_vm3, %v1054_v43, 0.0  ;;  %v493_v44 = vlaneseq }
 0x35f   :  { %v338_v47 = vsel %vm274_vm3, %v1056_v45, 0.0 }
 0x361   :  { %336 = vadd.xlane.f32.xlu0 %v335_v46 }
 0x362   :  { %339 = vadd.xlane.f32.xlu1 %v338_v47  ;;  %v1292_v47 = vld [vmem:[%s1374_s9] sm:$0x3f] }
 0x373   :  { %369 = vrot.lane.b32.xlu1 %v1191_v17, %s1087_s26 }
 0x377   :  { %367 = vrot.lane.b32.xlu0 %v1180_v15, %s1087_s26 }
 0x3da   :  { %v334_v48 = vpop.xlane.xlu1 %333 }
 0x3de   :  { %v331_v49 = vpop.xlane.xlu0 %330  ;;  %v328_v50 = vpop.xlane.xlu1 %327 }
 0x3df   :  { %1057 = vrcp.f32 %v328_v50  ;;  %v554_v50 = vld [vmem:[%s1375_s1] sm:$0xff] }
 0x3e0   :  { %1059 = vrcp.f32 %v331_v49 }
 0x3e2   :  { %v325_v51 = vpop.xlane.xlu0 %324 }
 0x3e3   :  { %1061 = vrcp.f32 %v325_v51 }
 0x3e4   :  { %1063 = vrcp.f32 %v334_v48 }
 0x3e6   :  { %v343_v52 = vpop.xlane.xlu0 %342 }
 0x3e7   :  { %v346_v53 = vpop.xlane.xlu1 %345  ;;  %1065 = vrcp.f32 %v343_v52 }
 0x3e8   :  { %1067 = vrcp.f32 %v346_v53 }
 0x3ea   :  { %v337_v54 = vpop.xlane.xlu0 %336 }
 0x3eb   :  { %1069 = vrcp.f32 %v337_v54  ;;  %v340_v55 = vpop.xlane.xlu1 %339 }
 0x3ec   :  { %1071 = vrcp.f32 %v340_v55  ;;  %v1058_v17 = vpop.eup %1057  ;;  %v555_v55 = vld [vmem:[%s1375_s1 + $0x8] sm:$0xff] }
 0x3ed   :  { %v1060_v56 = vpop.eup %1059  ;;  %v356_v61 = vmul.f32 %v1058_v17, %v1044_v34 }
 0x3ee   :  { %v368_v59 = vpop.permute.xlu0 %367  ;;  %v357_v62 = vmul.f32 %v1060_v56, %v1046_v35 }
 0x3ef   :  { %v370_v57 = vpop.permute.xlu1 %369 }
 0x3f0   :  { %v1062_v15 = vpop.eup %1061  ;;  %944 = vmatprep.subr.bf16.mxu0 %v370_v57 }
 0x3f1   :  { %v1064_v58 = vpop.eup %1063  ;;  %945 = vmatpush3.bf16.msra.mxu0 %v370_v57  ;;  %v355_v60 = vmul.f32 %v1062_v15, %v1048_v38 }
 0x3f2   :  { %946 = vmatprep.subr.bf16.mxu0 %v368_v59  ;;  %v358_v1 = vmul.f32 %v1064_v58, %v1042_v31 }
 0x3f3   :  { %v363_v63 = vpack.c.bf16 %v356_v61, %v355_v60 }
 0x3f4   :  { %v1066_v2 = vpop.eup %1065  ;;  %v364_v3 = vpack.c.bf16 %v358_v1, %v357_v62 }
 0x3f5   :  { %947 = vmatpush3.bf16.msra.mxu0 %v368_v59  ;;  %948 = vmatprep.mubr.msk.bf16.mxu0 %vm274_vm3, %v363_v63  ;;  %v1068_v4 = vpop.eup %1067  ;;  %v361_v9 = vmul.f32 %v1066_v2, %v1050_v40 }
 0x3f6   :  { %956 = vmatprep.subr.bf16.mxu0 %v1081_v0  ;;  %v362_v10 = vmul.f32 %v1068_v4, %v1052_v41 }
 0x3f8   :  { %v1070_v5 = vpop.eup %1069  ;;  %949 = vmatmul.mubr.msk.bf16.vlgmr.msra.gmra.mxu0 %vm274_vm3, %v364_v3  ;;  %v366_v12 = vpack.c.bf16 %v362_v10, %v361_v9  ;;  %v1034_v9 = vld [vmem:[%s1377_s8 + $0x30] sm:$0xff]   ;;  %v1035_v10 = vld [vmem:[%s1377_s8 + $0x28] sm:$0xff]  }
 0x3f9   :  { %v1072_v6 = vpop.eup %1071  ;;  %v359_v7 = vmul.f32 %v1070_v5, %v1054_v43  ;;  %957 = vmatpush3.bf16.msra.mxu0 %v1029_v13 }
 0x3fa   :  { %v360_v8 = vmul.f32 %v1072_v6, %v1056_v45  ;;  %958 = vmatprep.subr.bf16.mxu0 %v1081_v0  ;;  %v1286_v45 = vshrl.u32 %v493_v44, 7  ;;  %v1031_v6 = vld [vmem:[%s1376_s6 + $0x8] sm:$0xff]  }
 0x3fc   :  { %v365_v11 = vpack.c.bf16 %v360_v8, %v359_v7  ;;  %v495_v46 = vsub.s32 0, %v1286_v45  ;;  %v1032_v7 = vld [vmem:[%s1376_s6] sm:$0xff]   ;;  %v1033_v8 = vld [vmem:[%s1377_s8 + $0x38] sm:$0xff]  }
 0x3fd   :  { %959 = vmatpush3.bf16.msra.mxu0 %v1030_v20  ;;  %973 = vmatpush3.bf16.msra.mxu1 %v1033_v8 }
 0x3fe   :  { %952 = vmatprep.mubr.msk.bf16.mxu0 %vm274_vm3, %v365_v11  ;;  %964 = vmatprep.subr.bf16.mxu0 %v1081_v0  ;;  %v496_v48 = vrot.slane %v1292_v47, %v495_v46  ;;  %v1036_v11 = vld [vmem:[%s1377_s8 + $0x20] sm:$0xff]  }
 0x3ff   :  { %974 = vmatprep.subr.bf16.mxu1 %v1081_v0 }
 0x400   :  { %953 = vmatmul.mubr.msk.bf16.gmra.mxu0 %vm274_vm3, %v366_v12  ;;  %v1037_v12 = vld [vmem:[%s1377_s8 + $0x18] sm:$0xff]  }
 0x401   :  { %960 = vmatprep.mubr.msk.bf16.mxu0 %vm1082_vm0, %v1081_v0  ;;  %975 = vmatpush3.bf16.msra.mxu1 %v1034_v9 }
 0x402   :  { %976 = vmatprep.subr.bf16.mxu1 %v1081_v0 }
 0x405   :  { %977 = vmatpush3.bf16.msra.mxu1 %v1035_v10 }
 0x406   :  { %978 = vmatprep.subr.bf16.mxu1 %v1081_v0 }
 0x409   :  { %979 = vmatpush3.bf16.msra.mxu1 %v1036_v11  ;;  %v807_v11 = vsub.s32 4, %v1286_v45 }
 0x40a   :  { %980 = vmatprep.subr.bf16.mxu1 %v1081_v0 }
 0x40d   :  { %981 = vmatpush3.bf16.msra.mxu1 %v1037_v12  ;;  %v813_v12 = vsub.s32 5, %v1286_v45 }
 0x40e   :  { %982 = vmatprep.subr.bf16.mxu1 %v1081_v0 }
 0x4b8   :  { %v950_v14 = vpop.f32.mrf.mxu0 }
 0x4ba   :  { %v425_v19 = vpop.f32.mrf.mxu0 }
 0x4bc   :  { %v951_v21 = vpop.f32.mrf.mxu0 }
 0x4bd   :  { %v1007_v18 = vpack.i.bf16 %v951_v21, %v950_v14 }
 0x4be   :  { %v428_v16 = vpop.f32.mrf.mxu0 }
 0x4bf   :  { %1008 = vrot.lane.b32.xlu1 %v1007_v18, %s1088_s0 }
 0x4c0   :  { %v954_v22 = vpop.f32.mrf.mxu0 }
 0x4c2   :  { %v441_v23 = vpop.f32.mrf.mxu0 }
 0x4c4   :  { %v955_v24 = vpop.f32.mrf.mxu0 }
 0x4c5   :  { %v1017_v25 = vpack.i.bf16 %v955_v24, %v954_v22 }
 0x4c6   :  { %v444_v26 = vpop.f32.mrf.mxu0 }
 0x4c7   :  { %v1012_v27 = vpack.i.bf16 %v444_v26, %v441_v23  ;;  %1018 = vrot.lane.b32.xlu1 %v1017_v25, %s1089_s29  ;;  %v593_v25 = vsub.s32 3, %v1286_v45 }
 0x4c9   :  { %1013 = vrot.lane.b32.xlu0 %v1012_v27, %s1090_s30 }
 0x531   :  { %v1009_v28 = vpop.permute.xlu1 %1008 }
 0x532   :  { %v1011_v29 = vunpack.i.h.bf16 %v1009_v28  ;;  %v1010_v30 = vunpack.i.l.bf16 %v1009_v28 }
 0x534   :  { %v480_v35 = vsel %vm160_vm2, %v425_v19, %v1010_v30  ;;  %v481_v36 = vsel %vm160_vm2, %v428_v16, %v1011_v29  ;;  %v587_v16 = vsub.s32 2, %v1286_v45  ;;  %v594_v29 = vrot.slane %v1292_v47, %v593_v25 }
 0x536   :  { %v588_v24 = vrot.slane %v1292_v47, %v587_v16 }
 0x539   :  { %v1019_v31 = vpop.permute.xlu1 %1018 }
 0x53a   :  { %v1021_v37 = vunpack.i.h.bf16 %v1019_v31  ;;  %v1020_v38 = vunpack.i.l.bf16 %v1019_v31 }
 0x53b   :  { %v1014_v32 = vpop.permute.xlu0 %1013 }
 0x53c   :  { %v1016_v33 = vunpack.i.h.bf16 %v1014_v32  ;;  %v1015_v34 = vunpack.i.l.bf16 %v1014_v32 }
 0x53e   :  { %v484_v39 = vsel %vm482_vm4, %v481_v36, %v1016_v33  ;;  %v483_v40 = vsel %vm482_vm4, %v480_v35, %v1015_v34  ;;  %v1038_v34 = vld [vmem:[%s1377_s8 + $0x10] sm:$0xff]   ;;  %v1039_v35 = vld [vmem:[%s1377_s8 + $0x8] sm:$0xff]   ;;  %v1040_v36 = vld [vmem:[%s1377_s8] sm:$0xff]  }
 0x53f   :  { %v487_v41 = vsel %vm485_vm5, %v484_v39, %v1021_v37  ;;  %v486_v42 = vsel %vm485_vm5, %v483_v40, %v1020_v38  ;;  %983 = vmatpush3.bf16.msra.mxu1 %v1038_v34  ;;  %v858_v37 = vld [vmem:[%s1378_s7] ss:$0 sm:$0xff]  ;;  %s1091_s7 = smov 32  }
 0x540   :  { %v488_v43 = vpack.c.bf16 %v487_v41, %v486_v42  ;;  %984 = vmatprep.subr.bf16.mxu1 %v1081_v0 }
 0x542   :  { %961 = vmatmul.mubr.msk.bf16.vlgmr.msra.gmra.mxu0 %vm509_vm6, %v488_v43 }
 0x543   :  { %968 = vmatprep.mubr.msk.bf16.mxu0 %vm1082_vm0, %v1081_v0  ;;  %965 = vmatpush3.bf16.msra.mxu0 %v1031_v6 }
 0x544   :  { %966 = vmatprep.subr.bf16.mxu0 %v1081_v0  ;;  %985 = vmatpush3.bf16.msra.mxu1 %v1039_v35 }
 0x545   :  { %986 = vmatprep.subr.bf16.mxu1 %v1081_v0  ;;  %v686_v0 = vsub.s32 1, %v1286_v45 }
 0x547   :  { %967 = vmatpush3.bf16.msra.mxu0 %v1032_v7 }
 0x548   :  { %987 = vmatpush3.bf16.msra.mxu1 %v1040_v36 }
 0x602   :  { %v547_v49 = vpop.f32.mrf.mxu0 }
 0x603   :  { %v548_v51 = vadd.f32 %v547_v49, %v496_v48  ;;  %v687_v49 = vrot.slane %v1292_v47, %v686_v0 }
 0x604   :  { %v962_v52 = vpop.f32.mrf.mxu0 }
 0x605   :  { %v556_v53 = vadd.f32 %v554_v50, %v548_v51 }
 0x606   :  { %v550_v54 = vpop.f32.mrf.mxu0 }
 0x607   :  { %v551_v17 = vadd.f32 %v550_v54, %v496_v48  ;;  %v558_v56 = vsel %vm509_vm6, %v556_v53, 0.0 }
 0x608   :  { %559 = vadd.xlane.f32.xlu0 %v558_v56  ;;  %v963_v57 = vpop.f32.mrf.mxu0 }
 0x609   :  { %v557_v15 = vadd.f32 %v555_v55, %v551_v17 }
 0x60b   :  { %v561_v58 = vsel %vm509_vm6, %v557_v15, 0.0 }
 0x60c   :  { %562 = vadd.xlane.f32.xlu1 %v561_v58 }
 0x691   :  { %v560_v59 = vpop.xlane.xlu0 %559 }
 0x692   :  { %v565_v60 = vmul.f32 0.03125, %v560_v59 }
 0x694   :  { %v567_v61 = vsub.f32 %v556_v53, %v565_v60 }
 0x695   :  { %v563_v62 = vpop.xlane.xlu1 %562 }
 0x696   :  { %v566_v63 = vmul.f32 0.03125, %v563_v62  ;;  %v569_v1 = vmul.f32 %v567_v61, %v567_v61 }
 0x698   :  { %v568_v2 = vsub.f32 %v557_v15, %v566_v63  ;;  %v571_v3 = vsel %vm509_vm6, %v569_v1, 0.0 }
 0x699   :  { %572 = vadd.xlane.f32.xlu0 %v571_v3 }
 0x69a   :  { %v570_v4 = vmul.f32 %v568_v2, %v568_v2 }
 0x69c   :  { %v574_v5 = vsel %vm509_vm6, %v570_v4, 0.0 }
 0x69d   :  { %575 = vadd.xlane.f32.xlu0 %v574_v5 }
 0x722   :  { %v573_v13 = vpop.xlane.xlu0 %572 }
 0x723   :  { %v577_v14 = vmul.f32 0.03125, %v573_v13  ;;  %v808_v13 = vrot.slane %v1292_v47, %v807_v11 }
 0x725   :  { %v579_v19 = vadd.f32 1e-05, %v577_v14 }
 0x726   :  { %v576_v20 = vpop.xlane.xlu0 %575 }
 0x727   :  { %1073 = vrsqrt.f32 %v579_v19  ;;  %v578_v21 = vmul.f32 0.03125, %v576_v20  ;;  %v814_v20 = vrot.slane %v1292_v47, %v813_v12 }
 0x729   :  { %v580_v18 = vadd.f32 1e-05, %v578_v21 }
 0x72b   :  { %1075 = vrsqrt.f32 %v580_v18 }
 0x734   :  { %v1074_v22 = vpop.eup %1073 }
 0x735   :  { %v583_v23 = vmul.f32 %v1074_v22, %v567_v61 }
 0x737   :  { %v589_v28 = vmul.f32 %v588_v24, %v583_v23 }
 0x738   :  { %v1076_v26 = vpop.eup %1075 }
 0x739   :  { %v584_v27 = vmul.f32 %v1076_v26, %v568_v2  ;;  %v595_v31 = vadd.f32 %v594_v29, %v589_v28 }
 0x73b   :  { %v590_v30 = vmul.f32 %v588_v24, %v584_v27 }
 0x73d   :  { %v596_v32 = vadd.f32 %v594_v29, %v590_v30 }
 0x73f   :  { %v597_v33 = vpack.c.bf16 %v596_v32, %v595_v31 }
 0x741   :  { %969 = vmatmul.mubr.msk.bf16.vlgmr.msra.gmra.mxu0 %vm509_vm6, %v597_v33 }
 0x801   :  { %v658_v38 = vpop.f32.mrf.mxu0 }
 0x802   :  { %v659_v40 = vadd.f32 %v858_v37, %v658_v38 }
 0x803   :  { %v970_v39 = vpop.f32.mrf.mxu0 }
 0x804   :  { %v665_v44 = vmax.f32 %v659_v40, 0.0 }
 0x805   :  { %v661_v41 = vpop.f32.mrf.mxu0 }
 0x806   :  { %v662_v42 = vadd.f32 %v858_v37, %v661_v41 }
 0x807   :  { %v971_v43 = vpop.f32.mrf.mxu0 }
 0x808   :  { %v666_v46 = vmax.f32 %v662_v42, 0.0 }
 0x80a   :  { %v667_v48 = vpack.c.bf16 %v666_v46, %v665_v44 }
 0x80c   :  { %989 = vmatmul.mubr.bf16.vlgmr.msra.gmra.mxu1 %v667_v48 }
 0x8cc   :  { %v770_v50 = vpop.f32.mrf.mxu1 }
 0x8cd   :  { %v771_v51 = vadd.f32 %v770_v50, %v687_v49 }
 0x8ce   :  { %v990_v52 = vpop.f32.mrf.mxu1 }
 0x8cf   :  { %v777_v53 = vadd.f32 %v771_v51, %v595_v31 }
 0x8d0   :  { %v773_v54 = vpop.f32.mrf.mxu1 }
 0x8d1   :  { %v774_v55 = vadd.f32 %v773_v54, %v687_v49  ;;  %v779_v17 = vsel %vm509_vm6, %v777_v53, 0.0 }
 0x8d2   :  { %780 = vadd.xlane.f32.xlu1 %v779_v17  ;;  %v991_v56 = vpop.f32.mrf.mxu1 }
 0x8d3   :  { %v778_v57 = vadd.f32 %v774_v55, %v596_v32 }
 0x8d5   :  { %v782_v15 = vsel %vm509_vm6, %v778_v57, 0.0 }
 0x8d6   :  { %783 = vadd.xlane.f32.xlu0 %v782_v15 }
 0x95b   :  { %v781_v58 = vpop.xlane.xlu1 %780 }
 0x95c   :  { %v785_v59 = vmul.f32 0.03125, %v781_v58 }
 0x95e   :  { %v787_v60 = vsub.f32 %v777_v53, %v785_v59 }
 0x95f   :  { %v784_v61 = vpop.xlane.xlu0 %783 }
 0x960   :  { %v786_v62 = vmul.f32 0.03125, %v784_v61  ;;  %v789_v63 = vmul.f32 %v787_v60, %v787_v60 }
 0x962   :  { %v788_v1 = vsub.f32 %v778_v57, %v786_v62  ;;  %v791_v2 = vsel %vm509_vm6, %v789_v63, 0.0 }
 0x963   :  { %792 = vadd.xlane.f32.xlu1 %v791_v2 }
 0x964   :  { %v790_v3 = vmul.f32 %v788_v1, %v788_v1 }
 0x966   :  { %v794_v4 = vsel %vm509_vm6, %v790_v3, 0.0 }
 0x967   :  { %795 = vadd.xlane.f32.xlu0 %v794_v4 }
 0x9ec   :  { %v793_v5 = vpop.xlane.xlu1 %792 }
 0x9ed   :  { %v797_v6 = vmul.f32 0.03125, %v793_v5 }
 0x9ef   :  { %v799_v7 = vadd.f32 1e-05, %v797_v6 }
 0x9f0   :  { %v796_v8 = vpop.xlane.xlu0 %795 }
 0x9f1   :  { %1077 = vrsqrt.f32 %v799_v7  ;;  %v798_v9 = vmul.f32 0.03125, %v796_v8 }
 0x9f3   :  { %v800_v10 = vadd.f32 1e-05, %v798_v9 }
 0x9f5   :  { %1079 = vrsqrt.f32 %v800_v10 }
 0x9fe   :  { %v1078_v14 = vpop.eup %1077 }
 0x9ff   :  { %v803_v19 = vmul.f32 %v1078_v14, %v787_v60 }
 0xa01   :  { %v809_v21 = vmul.f32 %v808_v13, %v803_v19 }
 0xa02   :  { %v1080_v18 = vpop.eup %1079 }
 0xa03   :  { %v815_v16 = vadd.f32 %v814_v20, %v809_v21  ;;  %v804_v22 = vmul.f32 %v1080_v18, %v788_v1 }
 0xa05   :  { %v818_v23 = vrot.slane %v815_v16, 4  ;;  %v810_v24 = vmul.f32 %v808_v13, %v804_v22 }
 0xa07   :  { %819 = vrot.lane.b32.xlu1 %v818_v23, %s1091_s7  ;;  %v816_v25 = vadd.f32 %v814_v20, %v810_v24 }
 0xa09   :  { %823 = vrot.lane.b32.xlu0 %v816_v25, %s1087_s26  ;;  %v826_v26 = vrot.slane %v816_v25, 4 }
 0xa0b   :  { %827 = vrot.lane.b32.xlu1 %v826_v26, %s1086_s3 }
 0xa79   :  { %v820_v45 = vpop.permute.xlu1 %819 }
 0xa7a   :  { %v830_v27 = vsel %vm509_vm6, %v815_v16, %v820_v45 }
 0xa7b   :  { %v824_v28 = vpop.permute.xlu0 %823 }
 0xa7c   :  { %v831_v47 = vsel %vm274_vm3, %v830_v27, %v824_v28 }
 0xa7d   :  { %v828_v29 = vpop.permute.xlu1 %827 }
 0xa7e   :  { %v832_v30 = vsel %vm99_vm1, %v831_v47, %v828_v29 }
 0xa7f   :  { %833 = vst [vmem:[%s1379_s10] sm:$0xf] %v832_v30 }

</bundles_post_ra>
